<compile_context>
chip_gen: v6e
topology: v6e:2x2x1
jax: 0.10.0
libtpu: 0.0.40
codegen_flags: <defaults>
</compile_context>

<pallas_src>
import jax
import jax.numpy as jnp
from jax.experimental import pallas as pl
from jax.experimental.pallas import tpu as pltpu


def _round_up(x: int, m: int) -> int:
    return ((x + m - 1) // m) * m


def _embed_kernel(labels_ref, table_ref, out_ref):
    # labels_ref: (TB, 1)          int32  (VMEM)
    # table_ref:  (C_pad, H)       f32/bf16 (VMEM, single-buffered, resident)
    # out_ref:    (TB, H)          same dtype as table
    tb = labels_ref.shape[0]
    c_pad = table_ref.shape[0]

    lbl = labels_ref[...]                                              # (TB, 1)
    class_ids = jax.lax.broadcasted_iota(jnp.int32, (tb, c_pad), 1)
    # 0/1 selection matrix in the table's dtype (exact in bf16 and f32).
    onehot = (lbl == class_ids).astype(table_ref.dtype)                # (TB, C_pad)

    if table_ref.dtype == jnp.float32:
        # Exact multi-pass f32 MXU lowering; keeps rows bit-identical to gather.
        acc = jnp.dot(onehot, table_ref[...],
                      preferred_element_type=jnp.float32,
                      precision=jax.lax.Precision.HIGHEST)
    else:
        # Native bf16 MXU path; 0/1 weights -> still exact row selection.
        acc = jnp.dot(onehot, table_ref[...],
                      preferred_element_type=jnp.float32)

    out_ref[...] = acc.astype(out_ref.dtype)


def label_embedder(labels: jax.Array, embedding_table: jax.Array,
                   *, block_b: int = 512) -> jax.Array:
    """Equivalent of PyTorch nn.Embedding forward: embedding_table[labels]."""
    assert labels.ndim == 1, "kernel handles a flat label vector; reshape outside"
    num_classes, hidden = embedding_table.shape
    batch = labels.shape[0]
    out_dtype = embedding_table.dtype
    itemsize = jnp.dtype(out_dtype).itemsize

    # --- Pad K (num_classes) to a multiple of 256 with zero rows so the
    # one-hot matmul fills whole MXU passes (256-wide on v6e/v7x, 128 on v5e).
    c_pad = _round_up(max(num_classes, 1), 256)
    if c_pad != num_classes:
        table = jnp.pad(embedding_table, ((0, c_pad - num_classes), (0, 0)))
    else:
        table = embedding_table

    # --- Sublane-dense batch blocks: TB is a multiple of 8, capped at block_b.
    tb = max(8, min(block_b, _round_up(batch, 8)))
    b_pad = _round_up(batch, tb)

    labels_i32 = labels.astype(jnp.int32)
    if b_pad != batch:
        # Pad with 0 (a valid class); padded rows are sliced off below.
        labels_i32 = jnp.pad(labels_i32, (0, b_pad - batch))
    labels_2d = labels_i32.reshape(b_pad, 1)

    grid = (b_pad // tb,)

    # --- Explicit VMEM budget: table (1 buffer) + 2x out tile + 2x label tile
    # + onehot temp, with ~50% headroom, clamped to a safe ceiling.
    table_bytes = c_pad * hidden * itemsize
    out_tile_bytes = tb * hidden * itemsize
    onehot_bytes = tb * c_pad * max(itemsize, 2)
    label_bytes = tb * 1 * 4
    vmem_budget = int(1.5 * (table_bytes + 2 * out_tile_bytes
                             + onehot_bytes + 2 * label_bytes)) + (1 << 20)
    vmem_budget = max(vmem_budget, 4 << 20)
    vmem_budget = min(vmem_budget, 64 << 20)

    cost = pl.CostEstimate(
        flops=2 * b_pad * c_pad * hidden,
        transcendentals=0,
        bytes_accessed=table_bytes + b_pad * 4 + b_pad * hidden * itemsize,
    )

    out = pl.pallas_call(
        _embed_kernel,
        grid=grid,
        in_specs=[
            # Per-step block of labels, shaped (TB, 1): sublane dim multiple
            # of 8, lane dim equals the full array dim.
            pl.BlockSpec((tb, 1), lambda i: (i, 0)),
            # Full embedding table, same block every step -> VMEM-resident.
            # Single-buffered: the second pipeline buffer would never be used.
            pl.BlockSpec((c_pad, hidden), lambda i: (0, 0),
                         pipeline_mode=pl.Buffered(1)),
        ],
        out_specs=pl.BlockSpec((tb, hidden), lambda i: (i, 0)),
        out_shape=jax.ShapeDtypeStruct((b_pad, hidden), out_dtype),
        compiler_params=pltpu.CompilerParams(
            # Tiny grid; "parallel" would duplicate the table DMA per TC on
            # v7x for a memory-bound gather -> keep it on one core.
            dimension_semantics=("arbitrary",),
            vmem_limit_bytes=vmem_budget,
        ),
        cost_estimate=cost,
    )(labels_2d, table)

    return out[:batch]


if __name__ == "__main__":
    num_classes = 16
    hidden_size = 128
    batch = 8

    key = jax.random.PRNGKey(0)
    k_table, k_labels = jax.random.split(key)

    # nn.Embedding default init: weight ~ N(0, 1)
    embedding_table = jax.random.normal(
        k_table, (num_classes, hidden_size), dtype=jnp.float32
    )
    labels = jax.random.randint(
        k_labels, (batch,), minval=0, maxval=num_classes, dtype=jnp.int32
    )

    # f32 path: must be bit-identical to a gather.
    out = label_embedder(labels, embedding_table)
    out = jax.block_until_ready(out)
    ref = embedding_table[labels]
    assert out.shape == (batch, hidden_size)
    assert out.dtype == jnp.float32
    assert jnp.array_equal(out, ref)

    # bf16 path: 0/1 one-hot selection stays exact row selection in bf16.
    table_bf16 = embedding_table.astype(jnp.bfloat16)
    out_bf16 = jax.block_until_ready(label_embedder(labels, table_bf16))
    assert out_bf16.dtype == jnp.bfloat16
    assert jnp.array_equal(out_bf16, table_bf16[labels])

    print("KERNEL_OK")
</pallas_src>

<mosaic_0001>
module attributes {stable_mosaic.version = 11 : i64} {
  func.func @_embed_kernel(%arg0: i32, %arg1: memref<8x1xi32, #tpu.memory_space<vmem>>, %arg2: memref<256x128xf32, #tpu.memory_space<vmem>>, %arg3: memref<8x128xf32, #tpu.memory_space<vmem>>) attributes {dimension_semantics = [#tpu.dimension_semantics<arbitrary>], iteration_bounds = array<i64: 1>, scalar_prefetch = 0 : i64, scratch_operands = 0 : i64, tpu.core_type = #tpu.core_type<tc>, window_params = [{transform_indices = @transform_0, window_bounds = array<i64: 8, 1>}, {pipeline_mode = #tpu.pipeline_mode<synchronous>, transform_indices = @transform_1, window_bounds = array<i64: 256, 128>}, {transform_indices = @transform_2, window_bounds = array<i64: 8, 128>}]} {
    %c0 = arith.constant 0 : index
    %c0_0 = arith.constant 0 : index
    %0 = vector.load %arg1[%c0, %c0_0] : memref<8x1xi32, #tpu.memory_space<vmem>>, vector<8x1xi32>
    %1 = tpu.iota {dimensions = array<i32: 1>} : vector<8x256xi32>
    %2 = vector.broadcast %0 : vector<8x1xi32> to vector<8x256xi32>
    %3 = arith.cmpi eq, %2, %1 : vector<8x256xi32>
    %4 = arith.extui %3 : vector<8x256xi1> to vector<8x256xi32>
    %5 = arith.sitofp %4 : vector<8x256xi32> to vector<8x256xf32>
    %c0_1 = arith.constant 0 : index
    %c0_2 = arith.constant 0 : index
    %6 = vector.load %arg2[%c0_1, %c0_2] : memref<256x128xf32, #tpu.memory_space<vmem>>, vector<256x128xf32>
    %cst = arith.constant dense<0.000000e+00> : vector<8x128xf32>
    %7 = tpu.matmul %5, %6, %cst {dimension_numbers = #tpu.dot_dimension_numbers<[1], [0], [0], [1], [0, 0, 1, 1], [], []>, precision = #tpu.contract_precision<fp32>} : vector<8x256xf32>, vector<256x128xf32>, vector<8x128xf32> -> vector<8x128xf32>
    %c0_3 = arith.constant 0 : index
    %c0_4 = arith.constant 0 : index
    %8 = vector.load %arg3[%c0_3, %c0_4] : memref<8x128xf32, #tpu.memory_space<vmem>>, vector<8x128xf32>
    tpu.vector_store %arg3[%c0_3, %c0_4], %7 {strides = array<i32>} : memref<8x128xf32, #tpu.memory_space<vmem>>, vector<8x128xf32>,
    return
  }
  func.func @transform_0(%arg0: i32) -> (i32, i32) {
    %c0_i32 = arith.constant 0 : i32
    %c0_i32_0 = arith.constant 0 : i32
    return %arg0, %c0_i32 : i32, i32
  }
  func.func @transform_1(%arg0: i32) -> (i32, i32) {
    %c0_i32 = arith.constant 0 : i32
    %c0_i32_0 = arith.constant 0 : i32
    %c0_i32_1 = arith.constant 0 : i32
    return %c0_i32, %c0_i32_0 : i32, i32
  }
  func.func @transform_2(%arg0: i32) -> (i32, i32) {
    %c0_i32 = arith.constant 0 : i32
    %c0_i32_0 = arith.constant 0 : i32
    return %arg0, %c0_i32 : i32, i32
  }
}

</mosaic_0001>

<bundles_post_ra>
// kernel: tpu_custom_call.1
= control target key start
LH: loop header
LB: loop body
LE: loop exit
PB: predicated region body
PF: predicated region fallthrough
CT: control target
= control target key end

     0   :  { %7 = vsyncpa [#allocation3], 0  ;;  %s1776_s0 = inlined_call_operand.vmem [shape: s32[8,1], index: 0, kind: input, shape index: {}]   ;;  %s1777_s1 = inlined_call_operand.hbm [shape: f32[256,128], index: 1, kind: input, shape index: {}]   ;;  %s1778_s2 = inlined_call_operand.hbm [shape: f32[8,128], index: 2, kind: output, shape index: {}]  }
   0x1   :  { %8 = vsyncpa [#allocation4], 0  ;;  %s1219_s9 = smov [#allocation2]  }
   0x2   :  { %s16_s10 = sshll.u32 %s1219_s9, 4  ;;  %s17_s10 = int_to_ptr.vmem [resolvable:$true] %s16_s10 }
   0x3   :  { %s1183_s11 = scalar_lea.vmem %s17_s10, 4096  ;;  %p1188_p1 = scmp.lt.s32.totalorder %s17_s10, %s17_s10 }
   0x4   :  { %p1184_p0 = scmp.ne.s32.totalorder %s17_s10, %s1183_s11  ;;  %p1189_p2 = scmp.lt.s32.totalorder %s1183_s11, %s1183_s11 }
   0x6   :  { %p1190_p3 = por %p1189_p2, %p1188_p1 }
   0x8   :  { %p1191_p4 = pnand %p1190_p3, %p1184_p0 }
   0xa   :  { %1194 = shalt.err (!%p1191_p4)
}
   0xb   :  { %s1220_s12 = smov 128   ;;  %s1221_s13 = smov 8  }
   0xc   :  { %22 = dma.hbm_to_vmem [thread:$0]  %s1777_s1, 4096, %s17_s10, [#allocation3], %s1220_s12, %s1220_s12, %s1221_s13  }
   0xd   :  { %1215 = dma.done.wait [#allocation3], 4096  }
   0xe   :  { %1216 = vsyncadd [#allocation3], 4294963200  ;;  %v1222_v0 = vmov 0   ;;  %v26_v1 = vld [vmem:[%s1776_s0] sm:$0xff]  ;;  %v70_v2 = vld [vmem:[#allocation2 + $0xf8] sm:$0xff]  ;;  %s1225_s0 = smov [#allocation5]  }
   0xf   :  { %1174 = vset.pattern.permute.xlu0 %v1222_v0  ;;  %v54_v3 = vld [vmem:[#allocation2 + $0x78] sm:$0xff]  ;;  %v1247_v4 = vand.u32 4294901760, %v70_v2  ;;  %v69_v6 = vld [vmem:[#allocation2 + $0xf0] sm:$0xff]  ;;  %v68_v8 = vld [vmem:[#allocation2 + $0xe8] sm:$0xff]  ;;  %s940_s1 = sshll.u32 %s1225_s0, 4  ;;  %s941_s1 = int_to_ptr.vmem [resolvable:$true] %s940_s1 }
  0x10   :  { %31 = vperm.xlu0 %1174, %v26_v1   ;;  %v1249_v5 = vand.u32 4294901760, %v54_v3  ;;  %v53_v7 = vld [vmem:[#allocation2 + $0x70] sm:$0xff]  ;;  %v1251_v9 = vand.u32 4294901760, %v69_v6  ;;  %v1255_v11 = vand.u32 4294901760, %v68_v8  ;;  %v52_v12 = vld [vmem:[#allocation2 + $0x68] sm:$0xff]  ;;  %v67_v13 = vld [vmem:[#allocation2 + $0xe0] sm:$0xff]  ;;  %p1200_p6 = scmp.lt.s32.totalorder %s941_s1, %s941_s1 }
  0x11   :  { %v1253_v10 = vand.u32 4294901760, %v53_v7  ;;  %v51_v14 = vld [vmem:[#allocation2 + $0x60] sm:$0xff]  ;;  %v1258_v15 = vsub.f32 %v70_v2, %v1247_v4  ;;  %v1263_v17 = vand.u32 4294901760, %v52_v12  ;;  %v1265_v18 = vand.u32 4294901760, %v67_v13  ;;  %957 = vmatprep.subr.mxu0 %v1247_v4  ;;  %v66_v39 = vld [vmem:[#allocation2 + $0xd8] sm:$0xff]  ;;  %v65_v45 = vld [vmem:[#allocation2 + $0xd0] sm:$0xff] }
  0x12   :  { %v1261_v16 = vsub.f32 %v54_v3, %v1249_v5  ;;  %v1269_v19 = vsub.f32 %v69_v6, %v1251_v9  ;;  %v1275_v21 = vsub.f32 %v68_v8, %v1255_v11  ;;  %v1277_v22 = vand.u32 4294901760, %v51_v14  ;;  %958 = vmatpush3.msra.mxu0 %v1249_v5  ;;  %v50_v40 = vld [vmem:[#allocation2 + $0x58] sm:$0xff]  ;;  %v49_v46 = vld [vmem:[#allocation2 + $0x50] sm:$0xff]  ;;  %v64_v47 = vld [vmem:[#allocation2 + $0xc8] sm:$0xff]  ;;  %s1195_s18 = scalar_lea.vmem %s941_s1, 128 }
  0x13   :  { %v1272_v20 = vsub.f32 %v53_v7, %v1253_v10  ;;  %v1798_v23 = vand.u32 4294901760, %v1258_v15  ;;  %v1283_v25 = vsub.f32 %v52_v12, %v1263_v17  ;;  %v1286_v26 = vsub.f32 %v67_v13, %v1265_v18  ;;  %959 = vmatprep.subr.mxu0 %v1251_v9  ;;  %v48_v52 = vld [vmem:[#allocation2 + $0x48] sm:$0xff]  ;;  %v63_v53 = vld [vmem:[#allocation2 + $0xc0] sm:$0xff]  ;;  %p1196_p5 = scmp.ne.s32.totalorder %s941_s1, %s1195_s18  ;;  %p1201_p7 = scmp.lt.s32.totalorder %s1195_s18, %s1195_s18 }
  0x14   :  { %v1795_v24 = vand.u32 4294901760, %v1261_v16  ;;  %v1794_v27 = vand.u32 4294901760, %v1269_v19  ;;  %v1790_v29 = vand.u32 4294901760, %v1275_v21  ;;  %v1293_v30 = vsub.f32 %v51_v14, %v1277_v22  ;;  %960 = vmatpush3.msra.mxu0 %v1253_v10  ;;  %v47_v58 = vld [vmem:[#allocation2 + $0x40] sm:$0xff] }
  0x15   :  { %v1793_v28 = vand.u32 4294901760, %v1272_v20  ;;  %v299_v31 = vsub.f32 %v1258_v15, %v1798_v23  ;;  %v1789_v33 = vand.u32 4294901760, %v1283_v25  ;;  %v1788_v34 = vand.u32 4294901760, %v1286_v26  ;;  %961 = vmatprep.subr.mxu0 %v1255_v11  ;;  %v57_v23 = vld [vmem:[#allocation2 + $0x90] sm:$0xff]  ;;  %p1202_p8 = por %p1201_p7, %p1200_p6 }
  0x16   :  { %v187_v32 = vsub.f32 %v1261_v16, %v1795_v24  ;;  %v306_v35 = vsub.f32 %v1269_v19, %v1794_v27  ;;  %v313_v37 = vsub.f32 %v1275_v21, %v1790_v29  ;;  %v1786_v38 = vand.u32 4294901760, %v1293_v30  ;;  %962 = vmatpush3.msra.mxu0 %v1263_v17  ;;  %v42_v27 = vld [vmem:[#allocation2 + $0x18] sm:$0xff] }
  0x17   :  { %v194_v36 = vsub.f32 %v1272_v20, %v1793_v28  ;;  %v300_v41 = vand.u32 4294901760, %v299_v31  ;;  %v201_v43 = vsub.f32 %v1283_v25, %v1789_v33  ;;  %v320_v44 = vsub.f32 %v1286_v26, %v1788_v34  ;;  %963 = vmatprep.subr.mxu0 %v1265_v18  ;;  %v58_v28 = vld [vmem:[#allocation2 + $0x98] sm:$0xff]  ;;  %p1203_p9 = pnand %p1202_p8, %p1196_p5 }
  0x18   :  { %v188_v42 = vand.u32 4294901760, %v187_v32  ;;  %v307_v48 = vand.u32 4294901760, %v306_v35  ;;  %v314_v50 = vand.u32 4294901760, %v313_v37  ;;  %v208_v51 = vsub.f32 %v1293_v30, %v1786_v38  ;;  %964 = vmatpush3.msra.mxu0 %v1277_v22 }
  0x19   :  { %v195_v49 = vand.u32 4294901760, %v194_v36  ;;  %992 = vmatprep.subr.mxu1 %v300_v41  ;;  %v202_v54 = vand.u32 4294901760, %v201_v43  ;;  %v321_v55 = vand.u32 4294901760, %v320_v44  ;;  %v1327_v56 = vand.u32 4294901760, %v66_v39 }
  0x1a   :  { %v1329_v57 = vand.u32 4294901760, %v50_v40  ;;  %993 = vmatpush3.msra.mxu1 %v188_v42  ;;  %v209_v59 = vand.u32 4294901760, %v208_v51  ;;  %v1331_v60 = vand.u32 4294901760, %v65_v45  ;;  %v1333_v61 = vand.u32 4294901760, %v49_v46 }
  0x1b   :  { %v1335_v62 = vand.u32 4294901760, %v64_v47  ;;  %994 = vmatprep.subr.mxu1 %v307_v48  ;;  %v1338_v63 = vsub.f32 %v66_v39, %v1327_v56  ;;  %v1343_v1 = vand.u32 4294901760, %v48_v52  ;;  %v1345_v2 = vand.u32 4294901760, %v63_v53  ;;  %965 = vmatprep.subr.mxu0 %v1327_v56  ;;  %v46_v48 = vld [vmem:[#allocation2 + $0x38] sm:$0xff] }
  0x1c   :  { %v1341_v0 = vsub.f32 %v50_v40, %v1329_v57  ;;  %995 = vmatpush3.msra.mxu1 %v195_v49  ;;  %v1349_v3 = vsub.f32 %v65_v45, %v1331_v60  ;;  %v1352_v6 = vsub.f32 %v49_v46, %v1333_v61  ;;  %v1357_v8 = vand.u32 4294901760, %v47_v58  ;;  %966 = vmatpush3.msra.mxu0 %v1329_v57 }
  0x1d   :  { %v1355_v7 = vsub.f32 %v64_v47, %v1335_v62  ;;  %996 = vmatprep.subr.mxu1 %v314_v50  ;;  %v1785_v12 = vand.u32 4294901760, %v1338_v63  ;;  %v1363_v14 = vsub.f32 %v48_v52, %v1343_v1  ;;  %v1366_v31 = vsub.f32 %v63_v53, %v1345_v2  ;;  %967 = vmatprep.subr.mxu0 %v1331_v60  ;;  %v62_v47 = vld [vmem:[#allocation2 + $0xb8] sm:$0xff]  ;;  %v61_v53 = vld [vmem:[#allocation2 + $0xb0] sm:$0xff] }
  0x1e   :  { %v1784_v13 = vand.u32 4294901760, %v1341_v0  ;;  %997 = vmatpush3.msra.mxu1 %v202_v54  ;;  %v1782_v32 = vand.u32 4294901760, %v1349_v3  ;;  %v1780_v35 = vand.u32 4294901760, %v1352_v6  ;;  %v1373_v37 = vsub.f32 %v47_v58, %v1357_v8  ;;  %968 = vmatpush3.msra.mxu0 %v1333_v61  ;;  %v45_v54 = vld [vmem:[#allocation2 + $0x30] sm:$0xff] }
  0x1f   :  { %1840 = vst [vmem:[#allocation8_spill] sm:$0xff] %v1366_v31  ;;  %v1779_v36 = vand.u32 4294901760, %v1355_v7  ;;  %998 = vmatprep.subr.mxu1 %v321_v55  ;;  %v327_v39 = vsub.f32 %v1338_v63, %v1785_v12  ;;  %v1781_v41 = vand.u32 4294901760, %v1363_v14  ;;  %v1783_v42 = vand.u32 4294901760, %v1366_v31  ;;  %969 = vmatprep.subr.mxu0 %v1335_v62  ;;  %v60_v55 = vld [vmem:[#allocation2 + $0xa8] sm:$0xff]  ;;  %v43_v12 = vld [vmem:[#allocation2 + $0x20] sm:$0xff] }
  0x20   :  { %1841 = vst [vmem:[#allocation9_spill] sm:$0xff] %v1373_v37  ;;  %v215_v40 = vsub.f32 %v1341_v0, %v1784_v13  ;;  %999 = vmatpush3.msra.mxu1 %v209_v59  ;;  %v334_v43 = vsub.f32 %v1349_v3, %v1782_v32  ;;  %v222_v44 = vsub.f32 %v1352_v6, %v1780_v35  ;;  %v1787_v46 = vand.u32 4294901760, %v1373_v37  ;;  %v59_v35 = vld [vmem:[#allocation2 + $0xa0] sm:$0xff] }
  0x21   :  { %v341_v45 = vsub.f32 %v1355_v7, %v1779_v36  ;;  %970 = vmatpush3.msra.mxu0 %v1343_v1  ;;  %v328_v49 = vand.u32 4294901760, %v327_v39  ;;  %v229_v51 = vsub.f32 %v1363_v14, %v1781_v41  ;;  %v348_v52 = vsub.f32 %v1366_v31, %v1783_v42 }
  0x22   :  { %v216_v50 = vand.u32 4294901760, %v215_v40  ;;  %971 = vmatprep.subr.mxu0 %v1345_v2  ;;  %v335_v58 = vand.u32 4294901760, %v334_v43  ;;  %v223_v59 = vand.u32 4294901760, %v222_v44  ;;  %v236_v39 = vsub.f32 %v1373_v37, %v1787_v46  ;;  %v44_v40 = vld [vmem:[#allocation2 + $0x28] sm:$0xff]  ;;  %v39_v37 = vld [vmem:[#allocation2] sm:$0xff] }
  0x23   :  { %v342_v36 = vand.u32 4294901760, %v341_v45  ;;  %972 = vmatpush3.msra.mxu0 %v1357_v8  ;;  %1000 = vmatprep.subr.mxu1 %v328_v49  ;;  %v230_v41 = vand.u32 4294901760, %v229_v51  ;;  %v349_v32 = vand.u32 4294901760, %v348_v52  ;;  %v1407_v42 = vand.u32 4294901760, %v62_v47 }
  0x24   :  { %v1409_v13 = vand.u32 4294901760, %v46_v48  ;;  %1001 = vmatpush3.msra.mxu1 %v216_v50  ;;  %v237_v43 = vand.u32 4294901760, %v236_v39  ;;  %v1411_v44 = vand.u32 4294901760, %v61_v53  ;;  %v1413_v45 = vand.u32 4294901760, %v45_v54 }
  0x25   :  { %v1415_v38 = vand.u32 4294901760, %v60_v55  ;;  %1002 = vmatprep.subr.mxu1 %v335_v58  ;;  %v1418_v46 = vsub.f32 %v62_v47, %v1407_v42  ;;  %v1423_v51 = vand.u32 4294901760, %v44_v40  ;;  %v1425_v52 = vand.u32 4294901760, %v59_v35  ;;  %973 = vmatprep.subr.mxu0 %v1407_v42 }
  0x26   :  { %v1421_v49 = vsub.f32 %v46_v48, %v1409_v13  ;;  %1003 = vmatpush3.msra.mxu1 %v223_v59  ;;  %v1429_v50 = vsub.f32 %v61_v53, %v1411_v44  ;;  %v1432_v39 = vsub.f32 %v45_v54, %v1413_v45  ;;  %v1437_v47 = vand.u32 4294901760, %v43_v12  ;;  %974 = vmatpush3.msra.mxu0 %v1409_v13 }
  0x27   :  { %1842 = vst [vmem:[#allocation10_spill] sm:$0xff] %v1418_v46  ;;  %v1435_v58 = vsub.f32 %v60_v55, %v1415_v38  ;;  %1004 = vmatprep.subr.mxu1 %v342_v36  ;;  %v1791_v48 = vand.u32 4294901760, %v1418_v46  ;;  %v1443_v59 = vsub.f32 %v44_v40, %v1423_v51  ;;  %v1446_v53 = vsub.f32 %v59_v35, %v1425_v52 }
  0x28   :  { %1843 = vst [vmem:[#allocation11_spill] sm:$0xff] %v1421_v49  ;;  %1844 = vst [vmem:[#allocation12_spill] sm:$0xff] %v1429_v50  ;;  %v1792_v34 = vand.u32 4294901760, %v1421_v49  ;;  %975 = vmatprep.subr.mxu0 %v1411_v44  ;;  %1005 = vmatpush3.msra.mxu1 %v230_v41  ;;  %v1796_v54 = vand.u32 4294901760, %v1429_v50  ;;  %v1797_v55 = vand.u32 4294901760, %v1432_v39  ;;  %v1453_v36 = vsub.f32 %v43_v12, %v1437_v47 }
  0x29   :  { %1845 = vst [vmem:[#allocation13_spill] sm:$0xff] %v1432_v39  ;;  %1846 = vst [vmem:[#allocation14_spill] sm:$0xff] %v1435_v58  ;;  %v1803_v33 = vand.u32 4294901760, %v1435_v58  ;;  %976 = vmatpush3.msra.mxu0 %v1413_v45  ;;  %1006 = vmatprep.subr.mxu1 %v349_v32  ;;  %v355_v35 = vsub.f32 %v1418_v46, %v1791_v48  ;;  %v1810_v40 = vand.u32 4294901760, %v1443_v59  ;;  %v1813_v29 = vand.u32 4294901760, %v1446_v53  ;;  %v55_v46 = vld [vmem:[#allocation2 + $0x80] sm:$0xff] }
  0x2a   :  { %1847 = vst [vmem:[#allocation15_spill] sm:$0xff] %v1443_v59  ;;  %1848 = vst [vmem:[#allocation16_spill] sm:$0xff] %v1446_v53  ;;  %v243_v41 = vsub.f32 %v1421_v49, %v1792_v34  ;;  %977 = vmatprep.subr.mxu0 %v1415_v38  ;;  %1007 = vmatpush3.msra.mxu1 %v237_v43  ;;  %v362_v12 = vsub.f32 %v1429_v50, %v1796_v54  ;;  %v56_v50 = vld [vmem:[#allocation2 + $0x88] sm:$0xff]  ;;  %v1850_v49 = vand.u32 4294901760, %v1453_v36 }
  0x2b   :  { %1849 = vst [vmem:[#allocation17_spill] sm:$0xff] %v1453_v36  ;;  %v250_v32 = vsub.f32 %v1432_v39, %v1797_v55  ;;  %v369_v48 = vsub.f32 %v1435_v58, %v1803_v33  ;;  %978 = vmatpush3.msra.mxu0 %v1423_v51  ;;  %v356_v24 = vand.u32 4294901760, %v355_v35  ;;  %v257_v54 = vsub.f32 %v1443_v59, %v1810_v40  ;;  %v41_v39 = vld [vmem:[#allocation2 + $0x10] sm:$0xff] }
  0x2c   :  { %v244_v43 = vand.u32 4294901760, %v243_v41  ;;  %v376_v55 = vsub.f32 %v1446_v53, %v1813_v29  ;;  %979 = vmatprep.subr.mxu0 %v1425_v52  ;;  %v363_v33 = vand.u32 4294901760, %v362_v12  ;;  %v264_v35 = vsub.f32 %v1453_v36, %v1850_v49  ;;  %v40_v41 = vld [vmem:[#allocation2 + $0x8] sm:$0xff] }
  0x2d   :  { %v251_v34 = vand.u32 4294901760, %v250_v32  ;;  %v370_v58 = vand.u32 4294901760, %v369_v48  ;;  %980 = vmatpush3.msra.mxu0 %v1437_v47  ;;  %1008 = vmatprep.subr.mxu1 %v356_v24  ;;  %v258_v40 = vand.u32 4294901760, %v257_v54  ;;  %v1487_v29 = vand.u32 4294901760, %v58_v28 }
  0x2e   :  { %v377_v59 = vand.u32 4294901760, %v376_v55  ;;  %v1489_v53 = vand.u32 4294901760, %v42_v27  ;;  %1009 = vmatpush3.msra.mxu1 %v244_v43  ;;  %v265_v12 = vand.u32 4294901760, %v264_v35  ;;  %v1491_v32 = vand.u32 4294901760, %v57_v23 }
  0x2f   :  { %v1493_v48 = vand.u32 4294901760, %v41_v39  ;;  %v1495_v31 = vand.u32 4294901760, %v56_v50  ;;  %1010 = vmatprep.subr.mxu1 %v363_v33  ;;  %v1498_v49 = vsub.f32 %v58_v28, %v1487_v29  ;;  %v1503_v54 = vand.u32 4294901760, %v40_v41  ;;  %981 = vmatprep.subr.mxu0 %v1487_v29 }
  0x30   :  { %1851 = vst [vmem:[#allocation18_spill] sm:$0xff] %v1489_v53  ;;  %v1501_v24 = vsub.f32 %v42_v27, %v1489_v53  ;;  %v1505_v55 = vand.u32 4294901760, %v55_v46  ;;  %1011 = vmatpush3.msra.mxu1 %v251_v34  ;;  %v1509_v43 = vsub.f32 %v57_v23, %v1491_v32  ;;  %v1517_v28 = vand.u32 4294901760, %v39_v37  ;;  %982 = vmatpush3.msra.mxu0 %v1489_v53 }
  0x31   :  { %1852 = vst [vmem:[#allocation19_spill] sm:$0xff] %v1498_v49  ;;  %v1512_v35 = vsub.f32 %v41_v39, %v1493_v48  ;;  %v1515_v33 = vsub.f32 %v56_v50, %v1495_v31  ;;  %1012 = vmatprep.subr.mxu1 %v370_v58  ;;  %v1824_v27 = vand.u32 4294901760, %v1498_v49  ;;  %v1523_v34 = vsub.f32 %v40_v41, %v1503_v54 }
  0x32   :  { %1853 = vst [vmem:[#allocation20_spill] sm:$0xff] %v1501_v24  ;;  %1854 = vst [vmem:[#allocation21_spill] sm:$0xff] %v1509_v43  ;;  %v1827_v36 = vand.u32 4294901760, %v1501_v24  ;;  %v1526_v23 = vsub.f32 %v55_v46, %v1505_v55  ;;  %983 = vmatprep.subr.mxu0 %v1491_v32  ;;  %1013 = vmatpush3.msra.mxu1 %v258_v40  ;;  %v1830_v50 = vand.u32 4294901760, %v1509_v43 }
  0x33   :  { %1855 = vst [vmem:[#allocation22_spill] sm:$0xff] %v1512_v35  ;;  %v1533_v58 = vsub.f32 %v39_v37, %v1517_v28  ;;  %984 = vmatpush3.msra.mxu0 %v1493_v48  ;;  %1014 = vmatprep.subr.mxu1 %v377_v59  ;;  %v383_v46 = vsub.f32 %v1498_v49, %v1824_v27  ;;  %v1856_v59 = vand.u32 4294901760, %v1512_v35  ;;  %v1857_v27 = vand.u32 4294901760, %v1515_v33 }
  0x34   :  { %v271_v40 = vsub.f32 %v1501_v24, %v1827_v36  ;;  %985 = vmatprep.subr.mxu0 %v1495_v31  ;;  %1015 = vmatpush3.msra.mxu1 %v265_v12  ;;  %v390_v37 = vsub.f32 %v1509_v43, %v1830_v50  ;;  %v1858_v12 = vand.u32 4294901760, %v1523_v34  ;;  %v1859_v50 = vand.u32 4294901760, %v1526_v23 }
  0x35   :  { %v278_v53 = vsub.f32 %v1512_v35, %v1856_v59  ;;  %v397_v49 = vsub.f32 %v1515_v33, %v1857_v27  ;;  %v1835_v36 = vand.u32 4294901760, %v1533_v58  ;;  %986 = vmatpush3.msra.mxu0 %v1503_v54  ;;  %v384_v39 = vand.u32 4294901760, %v383_v46 }
  0x36   :  { %v272_v41 = vand.u32 4294901760, %v271_v40  ;;  %v285_v24 = vsub.f32 %v1523_v34, %v1858_v12  ;;  %v404_v43 = vsub.f32 %v1526_v23, %v1859_v50  ;;  %987 = vmatprep.subr.mxu0 %v1505_v55  ;;  %v391_v59 = vand.u32 4294901760, %v390_v37 }
  0x37   :  { %v279_v35 = vand.u32 4294901760, %v278_v53  ;;  %v292_v27 = vsub.f32 %v1533_v58, %v1835_v36  ;;  %988 = vmatpush3.msra.mxu0 %v1517_v28  ;;  %1016 = vmatprep.subr.mxu1 %v384_v39  ;;  %v398_v46 = vand.u32 4294901760, %v397_v49  ;;  %v27_v53 = vlaneseq  ;;  %v1869_v36 = vld [vmem:[#allocation15_spill] sm:$0xff] }
  0x38   :  { %1027 = vmatprep.subr.mxu0 %v1258_v15  ;;  %1017 = vmatpush3.msra.mxu1 %v272_v41  ;;  %v286_v40 = vand.u32 4294901760, %v285_v24  ;;  %v405_v12 = vand.u32 4294901760, %v404_v43  ;;  %v1223_v24 = vmov 0.0   ;;  %v1836_v41 = vmov 1.0  }
  0x39   :  { %1018 = vmatprep.subr.mxu1 %v391_v59  ;;  %v293_v50 = vand.u32 4294901760, %v292_v27  ;;  %v1569_v37 = vand.u32 127, %v27_v53 }
  0x3a   :  { %1019 = vmatpush3.msra.mxu1 %v279_v35 }
  0x3b   :  { %1020 = vmatprep.subr.mxu1 %v398_v46  ;;  %1860 = vst [vmem:[#allocation23_spill] sm:$0xff] %v1569_v37  ;;  %v1572_v39 = vadd.s32 128, %v1569_v37 }
  0x3c   :  { %1021 = vmatpush3.msra.mxu1 %v286_v40 }
  0x3d   :  { %1022 = vmatprep.subr.mxu1 %v405_v12 }
  0x3e   :  { %1023 = vmatpush3.msra.mxu1 %v293_v50 }
  0x3f   :  { %1062 = vmatprep.subr.mxu1 %v1247_v4 }
  0x8b   :  { %v1574_v49 = vpop.permute.xlu0 %31 }
  0x8c   :  { %vm33_vm0 = vcmp.eq.s32.totalorder %v1574_v49, %v1569_v37  ;;  %vm34_vm1 = vcmp.eq.s32.totalorder %v1574_v49, %v1572_v39  ;;  %v1871_v37 = vld [vmem:[#allocation17_spill] sm:$0xff] }
  0x8d   :  { %v949_v43 = vsel %vm33_vm0, 1.0, %v1223_v24  ;;  %v950_v35 = vsel %vm34_vm1, 1.0, %v1223_v24  ;;  %951 = vmatprep.mubr.msk.f32.mxu1 %vm34_vm1, %v1836_v41 }
  0x8e   :  { %v168_v59 = vsub.f32 %v950_v35, %v950_v35  ;;  %v1590_v27 = vsub.f32 %v949_v43, %v949_v43  ;;  %952 = vmatmul.mubr.msk.f32.vlgmr.msra.gmra.mxu1 %vm33_vm0, %v1836_v41  ;;  %v1861_v43 = vld [vmem:[#allocation8_spill] sm:$0xff]  ;;  %v1862_v35 = vld [vmem:[#allocation9_spill] sm:$0xff] }
  0x8f   :  { %1063 = vmatpush3.msra.mxu1 %v1249_v5  ;;  %v1870_v41 = vld [vmem:[#allocation16_spill] sm:$0xff] }
  0x90   :  { %1064 = vmatprep.subr.mxu1 %v1251_v9  ;;  %v169_v46 = vand.u32 4294901760, %v168_v59  ;;  %v175_v40 = vand.u32 4294901760, %v1590_v27 }
  0x91   :  { %1065 = vmatpush3.msra.mxu1 %v1253_v10 }
  0x92   :  { %1066 = vmatprep.subr.mxu1 %v1255_v11  ;;  %652 = vmatprep.mubr.f32.mxu1 %v169_v46  ;;  %v170_v12 = vsub.f32 %v168_v59, %v169_v46  ;;  %v176_v50 = vsub.f32 %v1590_v27, %v175_v40  ;;  %v1864_v46 = vld [vmem:[#allocation18_spill] sm:$0xff] }
  0x93   :  { %1067 = vmatpush3.msra.mxu1 %v1263_v17 }
  0x94   :  { %1068 = vmatprep.subr.mxu1 %v1265_v18  ;;  %v171_v53 = vand.u32 4294901760, %v170_v12  ;;  %v177_v24 = vand.u32 4294901760, %v176_v50  ;;  %v1865_v12 = vld [vmem:[#allocation11_spill] sm:$0xff]  ;;  %v1866_v50 = vld [vmem:[#allocation12_spill] sm:$0xff] }
  0x95   :  { %1069 = vmatpush3.msra.mxu1 %v1277_v22 }
  0x96   :  { %1070 = vmatprep.subr.mxu1 %v1327_v56  ;;  %172 = vmatprep.mubr.f32.mxu0 %v171_v53  ;;  %v1867_v53 = vld [vmem:[#allocation13_spill] sm:$0xff] }
  0x97   :  { %1071 = vmatpush3.msra.mxu1 %v1329_v57  ;;  %178 = vmatmul.mubr.f32.vlgmr.msra.gmra.mxu0 %v177_v24  ;;  %v1868_v24 = vld [vmem:[#allocation14_spill] sm:$0xff] }
  0x98   :  { %1028 = vmatpush3.msra.mxu0 %v1261_v16  ;;  %1072 = vmatprep.subr.mxu1 %v1331_v60 }
  0x99   :  { %1029 = vmatprep.subr.mxu0 %v1269_v19  ;;  %545 = vmatprep.mubr.f32.mxu0 %v168_v59  ;;  %v1863_v59 = vld [vmem:[#allocation10_spill] sm:$0xff] }
  0x9a   :  { %1073 = vmatpush3.msra.mxu1 %v1333_v61  ;;  %1030 = vmatpush3.msra.mxu0 %v1272_v20 }
  0x9b   :  { %1074 = vmatprep.subr.mxu1 %v1335_v62  ;;  %1031 = vmatprep.subr.mxu0 %v1275_v21 }
  0x9c   :  { %1075 = vmatpush3.msra.mxu1 %v1343_v1  ;;  %1032 = vmatpush3.msra.mxu0 %v1283_v25 }
  0x9d   :  { %1076 = vmatprep.subr.mxu1 %v1345_v2  ;;  %1033 = vmatprep.subr.mxu0 %v1286_v26 }
  0x9e   :  { %1077 = vmatpush3.msra.mxu1 %v1357_v8  ;;  %1034 = vmatpush3.msra.mxu0 %v1293_v30 }
  0x9f   :  { %1078 = vmatprep.subr.mxu1 %v1407_v42  ;;  %1035 = vmatprep.subr.mxu0 %v1338_v63 }
  0xa0   :  { %1079 = vmatpush3.msra.mxu1 %v1409_v13  ;;  %1036 = vmatpush3.msra.mxu0 %v1341_v0 }
  0xa1   :  { %1080 = vmatprep.subr.mxu1 %v1411_v44  ;;  %1037 = vmatprep.subr.mxu0 %v1349_v3 }
  0xa2   :  { %1081 = vmatpush3.msra.mxu1 %v1413_v45  ;;  %1038 = vmatpush3.msra.mxu0 %v1352_v6 }
  0xa3   :  { %1082 = vmatprep.subr.mxu1 %v1415_v38  ;;  %1039 = vmatprep.subr.mxu0 %v1355_v7 }
  0xa4   :  { %1083 = vmatpush3.msra.mxu1 %v1423_v51  ;;  %1040 = vmatpush3.msra.mxu0 %v1363_v14 }
  0xa5   :  { %1084 = vmatprep.subr.mxu1 %v1425_v52  ;;  %1041 = vmatprep.subr.mxu0 %v1861_v43 }
  0xa6   :  { %1085 = vmatpush3.msra.mxu1 %v1437_v47  ;;  %1042 = vmatpush3.msra.mxu0 %v1862_v35 }
  0xa7   :  { %1086 = vmatprep.subr.mxu1 %v1487_v29  ;;  %1043 = vmatprep.subr.mxu0 %v1863_v59 }
  0xa8   :  { %1087 = vmatpush3.msra.mxu1 %v1864_v46  ;;  %1044 = vmatpush3.msra.mxu0 %v1865_v12 }
  0xa9   :  { %1088 = vmatprep.subr.mxu1 %v1491_v32  ;;  %1045 = vmatprep.subr.mxu0 %v1866_v50 }
  0xaa   :  { %1089 = vmatpush3.msra.mxu1 %v1493_v48  ;;  %1046 = vmatpush3.msra.mxu0 %v1867_v53  ;;  %v1872_v53 = vld [vmem:[#allocation19_spill] sm:$0xff] }
  0xab   :  { %1090 = vmatprep.subr.mxu1 %v1495_v31  ;;  %1047 = vmatprep.subr.mxu0 %v1868_v24  ;;  %v1873_v24 = vmov 1.0  }
  0xac   :  { %1091 = vmatpush3.msra.mxu1 %v1503_v54  ;;  %1048 = vmatpush3.msra.mxu0 %v1869_v36  ;;  %v1874_v36 = vld [vmem:[#allocation20_spill] sm:$0xff] }
  0xad   :  { %1092 = vmatprep.subr.mxu1 %v1505_v55  ;;  %1049 = vmatprep.subr.mxu0 %v1870_v41  ;;  %v1875_v41 = vld [vmem:[#allocation21_spill] sm:$0xff] }
  0xae   :  { %1093 = vmatpush3.msra.mxu1 %v1517_v28  ;;  %1050 = vmatpush3.msra.mxu0 %v1871_v37 }
  0xaf   :  { %656 = vmatmul.mubr.f32.vlgmr.msra.gmra.mxu1 %v175_v40  ;;  %1132 = vmatprep.subr.mxu1 %v1247_v4  ;;  %v1876_v40 = vld [vmem:[#allocation22_spill] sm:$0xff]  ;;  %v1877_v4 = vand.u32 4294901760, %v1258_v15  ;;  %v1882_v15 = vand.u32 4294901760, %v1283_v25  ;;  %v1890_v25 = vand.u32 4294901760, %v1363_v14 }
  0xb0   :  { %1051 = vmatprep.subr.mxu0 %v1872_v53  ;;  %1133 = vmatpush3.msra.mxu1 %v1249_v5  ;;  %v1878_v5 = vand.u32 4294901760, %v1261_v16  ;;  %v1883_v16 = vand.u32 4294901760, %v1286_v26  ;;  %v1891_v26 = vand.u32 4294901760, %v1861_v43  ;;  %v1909_v14 = vand.u32 4294901760, %v1876_v40 }
  0xb1   :  { %955 = vmatprep.mubr.msk.f32.mxu1 %vm34_vm1, %v1873_v24  ;;  %1052 = vmatpush3.msra.mxu0 %v1874_v36 }
  0xb2   :  { %1134 = vmatprep.subr.mxu1 %v1251_v9  ;;  %1053 = vmatprep.subr.mxu0 %v1875_v41  ;;  %v1879_v9 = vand.u32 4294901760, %v1269_v19  ;;  %v1886_v19 = vand.u32 4294901760, %v1341_v0 }
  0xb3   :  { %1135 = vmatpush3.msra.mxu1 %v1253_v10  ;;  %1054 = vmatpush3.msra.mxu0 %v1876_v40  ;;  %v1880_v10 = vand.u32 4294901760, %v1272_v20  ;;  %v1887_v20 = vand.u32 4294901760, %v1349_v3  ;;  %v1904_v3 = vand.u32 4294901760, %v1871_v37 }
  0xb4   :  { %1136 = vmatprep.subr.mxu1 %v1255_v11  ;;  %1055 = vmatprep.subr.mxu0 %v1515_v33  ;;  %v1881_v11 = vand.u32 4294901760, %v1275_v21  ;;  %v1888_v21 = vand.u32 4294901760, %v1352_v6 }
  0xb5   :  { %1137 = vmatpush3.msra.mxu1 %v1263_v17  ;;  %1056 = vmatpush3.msra.mxu0 %v1523_v34  ;;  %v1884_v17 = vand.u32 4294901760, %v1293_v30  ;;  %v1892_v30 = vand.u32 4294901760, %v1862_v35 }
  0xb6   :  { %1138 = vmatprep.subr.mxu1 %v1265_v18  ;;  %1057 = vmatprep.subr.mxu0 %v1526_v23  ;;  %v1885_v18 = vand.u32 4294901760, %v1338_v63  ;;  %v1900_v63 = vld [vmem:[#allocation15_spill] sm:$0xff] }
  0xb7   :  { %1139 = vmatpush3.msra.mxu1 %v1277_v22  ;;  %1058 = vmatpush3.msra.mxu0 %v1533_v58  ;;  %v1889_v22 = vand.u32 4294901760, %v1355_v7  ;;  %v1901_v0 = vand.u32 4294901760, %v1900_v63  ;;  %v1906_v7 = vand.u32 4294901760, %v1872_v53 }
  0xb8   :  { %1140 = vmatprep.subr.mxu1 %v1327_v56  ;;  %548 = vmatmul.mubr.f32.vlgmr.msra.gmra.mxu0 %v1590_v27  ;;  %v1894_v56 = vand.u32 4294901760, %v1865_v12 }
  0xb9   :  { %1097 = vmatprep.subr.mxu0 %v1877_v4  ;;  %1141 = vmatpush3.msra.mxu1 %v1329_v57  ;;  %v1895_v57 = vand.u32 4294901760, %v1866_v50 }
  0xba   :  { %1098 = vmatpush3.msra.mxu0 %v1878_v5  ;;  %953 = vmatprep.mubr.msk.f32.mxu0 %vm34_vm1, %v1873_v24 }
  0xbb   :  { %1142 = vmatprep.subr.mxu1 %v1331_v60  ;;  %1099 = vmatprep.subr.mxu0 %v1879_v9  ;;  %v1896_v60 = vld [vmem:[#allocation13_spill] sm:$0xff] }
  0xbc   :  { %1143 = vmatpush3.msra.mxu1 %v1333_v61  ;;  %1100 = vmatpush3.msra.mxu0 %v1880_v10  ;;  %v1897_v61 = vand.u32 4294901760, %v1896_v60 }
  0xbd   :  { %1144 = vmatprep.subr.mxu1 %v1335_v62  ;;  %1101 = vmatprep.subr.mxu0 %v1881_v11 }
  0xbe   :  { %1145 = vmatpush3.msra.mxu1 %v1343_v1  ;;  %1102 = vmatpush3.msra.mxu0 %v1882_v15  ;;  %v1902_v1 = vld [vmem:[#allocation16_spill] sm:$0xff] }
  0xbf   :  { %1146 = vmatprep.subr.mxu1 %v1345_v2  ;;  %1103 = vmatprep.subr.mxu0 %v1883_v16  ;;  %v1903_v2 = vand.u32 4294901760, %v1902_v1 }
  0xc0   :  { %1147 = vmatpush3.msra.mxu1 %v1357_v8  ;;  %1104 = vmatpush3.msra.mxu0 %v1884_v17  ;;  %v1907_v8 = vand.u32 4294901760, %v1874_v36 }
  0xc1   :  { %1148 = vmatprep.subr.mxu1 %v1407_v42  ;;  %1105 = vmatprep.subr.mxu0 %v1885_v18  ;;  %v1911_v42 = vand.u32 4294901760, %v1523_v34 }
  0xc2   :  { %1149 = vmatpush3.msra.mxu1 %v1409_v13  ;;  %1106 = vmatpush3.msra.mxu0 %v1886_v19  ;;  %v1908_v13 = vand.u32 4294901760, %v1875_v41 }
  0xc3   :  { %1150 = vmatprep.subr.mxu1 %v1411_v44  ;;  %1107 = vmatprep.subr.mxu0 %v1887_v20  ;;  %v1912_v44 = vand.u32 4294901760, %v1526_v23 }
  0xc4   :  { %1151 = vmatpush3.msra.mxu1 %v1413_v45  ;;  %1108 = vmatpush3.msra.mxu0 %v1888_v21  ;;  %v1913_v45 = vand.u32 4294901760, %v1533_v58 }
  0xc5   :  { %1152 = vmatprep.subr.mxu1 %v1415_v38  ;;  %1109 = vmatprep.subr.mxu0 %v1889_v22  ;;  %v1893_v38 = vand.u32 4294901760, %v1863_v59 }
  0xc6   :  { %1153 = vmatpush3.msra.mxu1 %v1423_v51  ;;  %1110 = vmatpush3.msra.mxu0 %v1890_v25 }
  0xc7   :  { %1154 = vmatprep.subr.mxu1 %v1425_v52  ;;  %1111 = vmatprep.subr.mxu0 %v1891_v26 }
  0xc8   :  { %1155 = vmatpush3.msra.mxu1 %v1437_v47  ;;  %1112 = vmatpush3.msra.mxu0 %v1892_v30 }
  0xc9   :  { %1156 = vmatprep.subr.mxu1 %v1487_v29  ;;  %1113 = vmatprep.subr.mxu0 %v1893_v38  ;;  %v1898_v29 = vld [vmem:[#allocation14_spill] sm:$0xff] }
  0xca   :  { %1157 = vmatpush3.msra.mxu1 %v1864_v46  ;;  %1114 = vmatpush3.msra.mxu0 %v1894_v56  ;;  %v1899_v62 = vand.u32 4294901760, %v1898_v29 }
  0xcb   :  { %1158 = vmatprep.subr.mxu1 %v1491_v32  ;;  %1115 = vmatprep.subr.mxu0 %v1895_v57 }
  0xcc   :  { %1159 = vmatpush3.msra.mxu1 %v1493_v48  ;;  %1116 = vmatpush3.msra.mxu0 %v1897_v61 }
  0xcd   :  { %1160 = vmatprep.subr.mxu1 %v1495_v31  ;;  %1117 = vmatprep.subr.mxu0 %v1899_v62  ;;  %v1910_v31 = vand.u32 4294901760, %v1515_v33 }
  0xce   :  { %1161 = vmatpush3.msra.mxu1 %v1503_v54  ;;  %1118 = vmatpush3.msra.mxu0 %v1901_v0 }
  0xcf   :  { %1162 = vmatprep.subr.mxu1 %v1505_v55  ;;  %1119 = vmatprep.subr.mxu0 %v1903_v2 }
  0xd0   :  { %1163 = vmatpush3.msra.mxu1 %v1517_v28  ;;  %1120 = vmatpush3.msra.mxu0 %v1904_v3 }
  0xd1   :  { %956 = vmatmul.mubr.msk.f32.vlgmr.msra.gmra.mxu1 %vm33_vm0, %v1873_v24  ;;  %1121 = vmatprep.subr.mxu0 %v1906_v7 }
  0xd2   :  { %1122 = vmatpush3.msra.mxu0 %v1907_v8 }
  0xd3   :  { %1123 = vmatprep.subr.mxu0 %v1908_v13 }
  0xd4   :  { %1124 = vmatpush3.msra.mxu0 %v1909_v14 }
  0xd5   :  { %1125 = vmatprep.subr.mxu0 %v1910_v31 }
  0xd6   :  { %1126 = vmatpush3.msra.mxu0 %v1911_v42 }
  0xd7   :  { %1127 = vmatprep.subr.mxu0 %v1912_v44 }
  0xd8   :  { %1128 = vmatpush3.msra.mxu0 %v1913_v45 }
  0xd9   :  { %954 = vmatmul.mubr.msk.f32.vlgmr.msra.gmra.mxu0 %vm33_vm0, %v1873_v24 }
 0x14e   :  { %v1024_v52 = vpop.f32.mrf.mxu1 }
 0x150   :  { %v1025_v32 = vpop.f32.mrf.mxu1 }
 0x151   :  { %v1026_v33 = vadd.f32 %v1025_v32, %v1024_v52 }
 0x157   :  { %v989_v51 = vpop.f32.mrf.mxu0 }
 0x159   :  { %v990_v47 = vpop.f32.mrf.mxu0 }
 0x15a   :  { %v991_v55 = vadd.f32 %v990_v47, %v989_v51 }
 0x15c   :  { %v412_v23 = vadd.f32 %v1026_v33, %v991_v55 }
 0x16f   :  { %v1094_v48 = vpop.f32.mrf.mxu1 }
 0x171   :  { %v1095_v34 = vpop.f32.mrf.mxu1 }
 0x172   :  { %v1096_v41 = vadd.f32 %v1095_v34, %v1094_v48 }
 0x178   :  { %v1059_v36 = vpop.f32.mrf.mxu0 }
 0x17a   :  { %v1060_v54 = vpop.f32.mrf.mxu0 }
 0x17b   :  { %v1061_v28 = vadd.f32 %v1060_v54, %v1059_v36 }
 0x17d   :  { %v550_v58 = vadd.f32 %v1061_v28, %v412_v23 }
 0x17f   :  { %v658_v49 = vadd.f32 %v1096_v41, %v550_v58 }
 0x191   :  { %v1164_v37 = vpop.f32.mrf.mxu1 }
 0x193   :  { %v1165_v27 = vpop.f32.mrf.mxu1 }
 0x194   :  { %v1166_v59 = vadd.f32 %v1165_v27, %v1164_v37 }
 0x199   :  { %v1129_v39 = vpop.f32.mrf.mxu0 }
 0x19b   :  { %v1130_v43 = vpop.f32.mrf.mxu0 }
 0x19c   :  { %v1131_v35 = vadd.f32 %v1130_v43, %v1129_v39 }
 0x19e   :  { %v826_v46 = vadd.f32 %v1131_v35, %v658_v49 }
 0x1a0   :  { %v930_v12 = vadd.f32 %v1166_v59, %v826_v46 }
 0x1a2   :  { %933 = vst [vmem:[#allocation5] sm:$0xff] %v930_v12 }
 0x1a3   :  { %1206 = shalt.err (!%p1203_p9)
}
 0x1a4   :  { %943 = dma.vmem_to_hbm [thread:$0]  %s941_s1, 128, %s1778_s2, [#allocation4]  }
 0x1a5   :  { %1217 = dma.done.wait [#allocation4], 128  }
 0x1a6   :  { %1218 = vsyncadd [#allocation4], 4294967168 }
 0x1a7   :  { %947 = vsyncpa [#allocation3], 1 }
 0x1a8   :  { %948 = vsyncpa [#allocation4], 1 }

</bundles_post_ra>
